<compile_context>
chip_gen: v7x
topology: tpu7x:2x2x1
jax: 0.10.0
libtpu: 0.0.40
codegen_flags: <defaults>
</compile_context>

<pallas_src>
import functools
import math

import jax
import jax.numpy as jnp
from jax import lax
from jax.experimental import pallas as pl
from jax.experimental.pallas import tpu as pltpu

_MIB = 1024 * 1024


# ----------------------------------------------------------------------------
# Plain-JAX glue: sampling / grouping (data-dependent gathers, tiny compute)
# ----------------------------------------------------------------------------

def farthest_point_sample(xyz, npoint, key):
    B, N, _ = xyz.shape
    # TODO(synk): torch.randint picks a random start per batch; we use a
    # jax.random start (still a valid FPS seeding, not bit-identical).
    farthest = jax.random.randint(key, (B,), 0, N, dtype=jnp.int32)
    distance = jnp.full((B, N), 1e10, dtype=xyz.dtype)
    batch_idx = jnp.arange(B)

    def step(carry, _):
        dist_c, far_c = carry
        centroid = xyz[batch_idx, far_c][:, None, :]             # (B,1,3)
        d = jnp.sum((xyz - centroid) ** 2, axis=-1)              # (B,N)
        dist_n = jnp.minimum(dist_c, d)
        far_n = jnp.argmax(dist_n, axis=-1).astype(jnp.int32)
        return (dist_n, far_n), far_c

    (_, _), cents = lax.scan(step, (distance, farthest), None, length=npoint)
    return jnp.transpose(cents)                                  # (B,npoint)


def index_points(points, idx):
    B = points.shape[0]
    raw = idx.shape
    flat = idx.reshape(B, -1)
    out = jnp.take_along_axis(points, flat[..., None], axis=1)
    return out.reshape(*raw, points.shape[-1])


def square_distance(src, dst):
    return jnp.sum((src[:, :, None, :] - dst[:, None, :, :]) ** 2, axis=-1)


def query_ball_point(radius, nsample, xyz, new_xyz):
    B, N, _ = xyz.shape
    S = new_xyz.shape[1]
    sqrdists = square_distance(new_xyz, xyz)                     # (B,S,N)
    group_idx = jnp.broadcast_to(jnp.arange(N), (B, S, N))
    group_idx = jnp.where(sqrdists > radius ** 2, N, group_idx)
    group_idx = jnp.sort(group_idx, axis=-1)[:, :, :nsample]
    group_first = jnp.broadcast_to(group_idx[:, :, :1], (B, S, nsample))
    group_idx = jnp.where(group_idx == N, group_first, group_idx)
    return group_idx


def sample_and_group(npoint, radius, nsample, xyz, points, key, knn=False):
    B, N, C = xyz.shape
    fps_idx = farthest_point_sample(xyz, npoint, key)
    new_xyz = index_points(xyz, fps_idx)                         # (B,S,3)
    if knn:
        dists = square_distance(new_xyz, xyz)
        idx = jnp.argsort(dists, axis=-1)[:, :, :nsample]
    else:
        idx = query_ball_point(radius, nsample, xyz, new_xyz)
    grouped_xyz = index_points(xyz, idx)                         # (B,S,K,3)
    grouped_xyz_norm = grouped_xyz - new_xyz[:, :, None, :]
    if points is not None:
        grouped_points = index_points(points, idx)               # (B,S,K,D)
        new_points = jnp.concatenate([grouped_xyz_norm, grouped_points], axis=-1)
    else:
        new_points = grouped_xyz_norm
    return new_xyz, new_points


def sample_and_group_all(xyz, points):
    B, N, C = xyz.shape
    new_xyz = jnp.zeros((B, 1, C), xyz.dtype)
    grouped_xyz = xyz[:, None, :, :]
    if points is not None:
        new_points = jnp.concatenate([grouped_xyz, points[:, None, :, :]], axis=-1)
    else:
        new_points = grouped_xyz
    return new_xyz, new_points


# ----------------------------------------------------------------------------
# Pallas kernel
# ----------------------------------------------------------------------------

def _layer_kernel(total_rows, k_real, has_row_pad, prenorm, is_last,
                  x_ref, *refs):
    """One MLP layer over a (T, Kp, Cin) row tile.

    [prev layer's fused BN scale/shift + ReLU] -> bf16 MXU matmul (f32 acc) ->
    {intermediate: write bf16 activation tile | last: per-row max/min over K}
    + per-tile partial per-channel sum / sum-of-squares for this layer's BN.
    """
    if prenorm:
        scale_ref, shift_ref, w_ref = refs[0], refs[1], refs[2]
        out_refs = refs[3:]
    else:
        w_ref = refs[0]
        out_refs = refs[1:]
    if is_last:
        max_ref, min_ref, sum_ref, sq_ref = out_refs
    else:
        y_ref, sum_ref, sq_ref = out_refs

    i = pl.program_id(0)
    T, Kp, Cin = x_ref.shape
    Cout = w_ref.shape[1]
    kpad = Kp != k_real

    x = x_ref[...].astype(jnp.float32)
    if prenorm:
        # previous layer's fused BatchNorm (scale/shift) + ReLU, in f32
        x = jnp.maximum(x * scale_ref[...] + shift_ref[...], 0.0)
        if kpad:
            # zero padded nsample columns so their matmul output stays exactly 0
            col = lax.broadcasted_iota(jnp.int32, (1, Kp, 1), 1)
            x = jnp.where(col < k_real, x, 0.0)

    # 1x1 Conv2d == one big 2D matmul on the MXU: (T*Kp, Cin) x (Cin, Cout)
    x2 = x.reshape(T * Kp, Cin).astype(jnp.bfloat16)
    y = jnp.dot(x2, w_ref[...], preferred_element_type=jnp.float32)
    y3 = y.reshape(T, Kp, Cout)

    if is_last:
        # ReLU ∘ (per-channel affine) is monotone: the post-BN max over the
        # nsample axis is recovered in plain JAX from max/min + sign(scale).
        if kpad:
            col = lax.broadcasted_iota(jnp.int32, (1, Kp, 1), 1)
            kmask = col < k_real
            max_ref[...] = jnp.max(jnp.where(kmask, y3, -jnp.inf), axis=1)
            min_ref[...] = jnp.min(jnp.where(kmask, y3, jnp.inf), axis=1)
        else:
            max_ref[...] = jnp.max(y3, axis=1)
            min_ref[...] = jnp.min(y3, axis=1)
    else:
        y_ref[...] = y3.astype(y_ref.dtype)        # bf16 inter-layer activation

    # Per-tile partial statistics from the f32 (pre-cast) matmul output.
    # Padded nsample columns are exactly zero, so only the padded rows of the
    # very last tile need masking.
    sum_ref[...] = jnp.sum(y3, axis=(0, 1))[None, :]
    sq_ref[...] = jnp.sum(y3 * y3, axis=(0, 1))[None, :]

    if has_row_pad:
        @pl.when(i == pl.num_programs(0) - 1)
        def _():
            rows = lax.broadcasted_iota(jnp.int32, (T, 1, 1), 0) + i * T
            ym = jnp.where(rows < total_rows, y3, 0.0)
            sum_ref[...] = jnp.sum(ym, axis=(0, 1))[None, :]
            sq_ref[...] = jnp.sum(ym * ym, axis=(0, 1))[None, :]


# ----------------------------------------------------------------------------
# Tiling / budget helpers
# ----------------------------------------------------------------------------

def _vmem_limit_bytes():
    """Per-generation scoped-VMEM budget: ~100 MiB on 128-MiB v5e/v6e,
    ~40 MiB on 64-MiB v7x.  Conservative fallback if the query fails."""
    try:
        cap = int(pltpu.get_tpu_info().vmem_capacity_bytes)
    except Exception:
        cap = 64 * _MIB
    return max(32 * _MIB, min(cap - 24 * _MIB, int(cap * 0.8)))


def _pick_row_tile(total, Kp, cin, cout, is_last, tile_budget_bytes):
    """Largest power-of-two row tile (8..1024) whose double-buffered VMEM
    footprint (lane-padded channels, bf16 in/out tiles, bf16 weights) fits."""
    cin_p = -(-max(cin, 1) // 128) * 128          # account for 128-lane padding
    cout_p = -(-max(cout, 1) // 128) * 128
    in_row = Kp * cin_p * 2                       # bf16 input tile per row
    out_row = (2 * cout_p * 4) if is_last else (Kp * cout_p * 2)
    per_row = in_row + out_row
    weight = cin_p * cout_p * 2
    avail = max(tile_budget_bytes - 2 * weight, 2 * per_row * 8)
    budget_rows = avail // (2 * per_row)          # x2 for double buffering
    cap = min(1024, max(8, pl.next_power_of_2(total)))
    t = 8
    while t * 2 <= min(budget_rows, cap):
        t *= 2
    return t


# ----------------------------------------------------------------------------
# MLP + max-pool hot path
# ----------------------------------------------------------------------------

def mlp_max_pallas(new_points, params, eps=1e-5):
    """new_points: (B, S, K, Cin) channels-last; returns (B, S, C_last) f32."""
    B, S, K, Cin0 = new_points.shape
    total = B * S
    n_layers = len(params)
    c_last = params[-1][0].shape[1]

    vmem_limit = _vmem_limit_bytes()
    tile_budget = int(vmem_limit * 0.7)

    Kp = -(-K // 8) * 8              # 8-aligned nsample: copy-free reshapes

    tiles = []
    for li, (w, _, _) in enumerate(params):
        cin, cout = w.shape
        tiles.append(_pick_row_tile(total, Kp, cin, cout,
                                    li == n_layers - 1, tile_budget))
    t_max = max(tiles)
    R = -(-total // t_max) * t_max   # common padded row count; every
    has_row_pad = R != total         # power-of-two tile divides it

    x = new_points.reshape(total, K, Cin0).astype(jnp.bfloat16)
    if R != total or Kp != K:
        x = jnp.pad(x, ((0, R - total), (0, Kp - K), (0, 0)))

    cnt = float(total * K)           # real sample count for BN statistics
    h = x
    scale = shift = None
    ymax = ymin = None

    for li, (w, gamma, beta) in enumerate(params):
        Cin, Cout = w.shape
        prenorm = li > 0
        is_last = li == n_layers - 1
        T = tiles[li]
        n_tiles = R // T

        ins = [h]
        in_specs = [pl.BlockSpec((T, Kp, Cin), lambda i: (i, 0, 0))]
        if prenorm:
            ins += [scale, shift]
            in_specs += [pl.BlockSpec((1, Cin), lambda i: (0, 0)),
                         pl.BlockSpec((1, Cin), lambda i: (0, 0))]
        ins.append(w)                # already bf16 (cached at construction)
        in_specs.append(pl.BlockSpec((Cin, Cout), lambda i: (0, 0)))

        stat_shape = jax.ShapeDtypeStruct((n_tiles, Cout), jnp.float32)
        stat_spec = pl.BlockSpec((1, Cout), lambda i: (i, 0))
        if is_last:
            out_shape = (jax.ShapeDtypeStruct((R, Cout), jnp.float32),
                         jax.ShapeDtypeStruct((R, Cout), jnp.float32),
                         stat_shape, stat_shape)
            out_specs = (pl.BlockSpec((T, Cout), lambda i: (i, 0)),
                         pl.BlockSpec((T, Cout), lambda i: (i, 0)),
                         stat_spec, stat_spec)
            out_bytes = R * Cout * 8
        else:
            out_shape = (jax.ShapeDtypeStruct((R, Kp, Cout), jnp.bfloat16),
                         stat_shape, stat_shape)
            out_specs = (pl.BlockSpec((T, Kp, Cout), lambda i: (i, 0, 0)),
                         stat_spec, stat_spec)
            out_bytes = R * Kp * Cout * 2

        flops = 2 * R * Kp * Cin * Cout
        bytes_acc = (R * Kp * Cin * 2 + Cin * Cout * 2 + out_bytes
                     + 2 * n_tiles * Cout * 4)

        kernel = functools.partial(_layer_kernel, total, K, has_row_pad,
                                   prenorm, is_last)
        outs = pl.pallas_call(
            kernel,
            out_shape=out_shape,
            grid=(n_tiles,),
            in_specs=in_specs,
            out_specs=out_specs,
            compiler_params=pltpu.CompilerParams(
                # No grid-carried state (per-tile partial stats), so the row
                # axis is fully parallel -> megacore-shardable on v7x.
                dimension_semantics=("parallel",),
                vmem_limit_bytes=vmem_limit),
            cost_estimate=pl.CostEstimate(
                flops=flops, transcendentals=0, bytes_accessed=bytes_acc),
        )(*ins)

        if is_last:
            ymax, ymin, psum, psq = outs
        else:
            h, psum, psq = outs

        # Fused training-mode BatchNorm (biased variance, one-pass stats):
        # scale = gamma * rsqrt(var + eps), shift = beta - mean * scale.
        mean = jnp.sum(psum, axis=0, keepdims=True) / cnt
        var = jnp.maximum(jnp.sum(psq, axis=0, keepdims=True) / cnt
                          - mean * mean, 0.0)
        scale = gamma * lax.rsqrt(var + eps)
        shift = beta - mean * scale

    # ReLU ∘ affine is per-channel monotone: the post-BN max over nsample is
    # relu(scale * (max_K y  if scale >= 0 else  min_K y) + shift).
    sel = jnp.where(scale >= 0.0, ymax, ymin)
    out = jnp.maximum(sel * scale + shift, 0.0)
    return out[:total].reshape(B, S, c_last)


# ----------------------------------------------------------------------------
# Module wrapper
# ----------------------------------------------------------------------------

class PointNetSetAbstraction:
    def __init__(self, npoint, radius, nsample, in_channel, mlp, group_all,
                 knn=False, key=None):
        self.npoint = npoint
        self.radius = radius
        self.nsample = nsample
        self.knn = knn
        self.group_all = group_all
        if key is None:
            key = jax.random.PRNGKey(42)
        last = in_channel
        self.params = []
        for k, out_ch in zip(jax.random.split(key, len(mlp)), mlp):
            bound = 1.0 / math.sqrt(last)
            w = jax.random.uniform(k, (last, out_ch), jnp.float32, -bound, bound)
            # NOTE: the Conv2d bias is omitted on purpose — with training-mode
            # BatchNorm right after the 1x1 conv, the bias is exactly cancelled
            # by the batch-mean subtraction (forward unchanged).
            # TODO(synk): eval-mode BN (running stats) would need the bias and
            # different scale/shift; only training-mode statistics are handled.
            gamma = jnp.ones((1, out_ch), jnp.float32)
            beta = jnp.zeros((1, out_ch), jnp.float32)
            # cache bf16 weights so the forward pass never re-casts them
            self.params.append((w.astype(jnp.bfloat16), gamma, beta))
            last = out_ch

    def __call__(self, xyz, points, key):
        if self.group_all:
            new_xyz, new_points = sample_and_group_all(xyz, points)
        else:
            new_xyz, new_points = sample_and_group(
                self.npoint, self.radius, self.nsample, xyz, points, key,
                knn=self.knn)
        # new_points: (B, S, K, Cin) -> Pallas hot path -> (B, S, C_last)
        new_points = mlp_max_pallas(new_points, self.params)
        return new_xyz, new_points


# ----------------------------------------------------------------------------
# Reference (plain JAX) for correctness check of the kernel hot path
# ----------------------------------------------------------------------------

def _ref_mlp_max(new_points, params, eps=1e-5):
    B, S, K, Cin = new_points.shape
    x = new_points.reshape(B * S, K, Cin).astype(jnp.float32)
    n_layers = len(params)
    z = None
    for li, (w, g, be) in enumerate(params):
        y = jnp.einsum('nkc,cd->nkd', x.astype(jnp.bfloat16),
                       w.astype(jnp.bfloat16),
                       preferred_element_type=jnp.float32)
        mean = jnp.mean(y, axis=(0, 1), keepdims=True)
        var = jnp.maximum(jnp.mean(y * y, axis=(0, 1), keepdims=True)
                          - mean * mean, 0.0)
        scale = g * lax.rsqrt(var + eps)
        shift = be - mean * scale
        if li + 1 < n_layers:
            # model the kernel's bf16 inter-layer activation storage
            y_st = y.astype(jnp.bfloat16).astype(jnp.float32)
            x = jnp.maximum(y_st * scale + shift, 0.0)
        else:
            z = jnp.maximum(y * scale + shift, 0.0)
    return jnp.max(z, axis=1).reshape(B, S, -1)


if __name__ == "__main__":
    key = jax.random.PRNGKey(0)
    k_xyz, k_pts, k_param, k_fps = jax.random.split(key, 4)

    B, N, D = 2, 32, 3          # small shapes
    xyz = jax.random.uniform(k_xyz, (B, N, 3), jnp.float32)
    points = jax.random.normal(k_pts, (B, N, D), jnp.float32)

    sa = PointNetSetAbstraction(npoint=8, radius=0.5, nsample=16,
                                in_channel=3 + D, mlp=[32, 64],
                                group_all=False, knn=False, key=k_param)

    new_xyz, new_points = sa(xyz, points, key=k_fps)
    jax.block_until_ready((new_xyz, new_points))

    # sanity check against a plain-JAX reference of the hot path
    _, grouped = sample_and_group(sa.npoint, sa.radius, sa.nsample,
                                  xyz, points, k_fps, knn=False)
    ref = _ref_mlp_max(grouped, sa.params)
    assert new_xyz.shape == (B, 8, 3)
    assert new_points.shape == (B, 8, 64)
    err = float(jnp.max(jnp.abs(new_points - ref)))
    assert jnp.allclose(new_points, ref, atol=2e-3, rtol=2e-3), err

    print("KERNEL_OK")
</pallas_src>

<mosaic_0001>
module attributes {stable_mosaic.version = 11 : i64} {
  func.func @_layer_kernel(%arg0: i32, %arg1: memref<16x16x6xbf16, #tpu.memory_space<vmem>>, %arg2: memref<6x32xbf16, #tpu.memory_space<vmem>>, %arg3: memref<16x16x32xbf16, #tpu.memory_space<vmem>>, %arg4: memref<1x32xf32, #tpu.memory_space<vmem>>, %arg5: memref<1x32xf32, #tpu.memory_space<vmem>>) attributes {dimension_semantics = [#tpu.dimension_semantics<parallel>], iteration_bounds = array<i64: 1>, scalar_prefetch = 0 : i64, scratch_operands = 0 : i64, tpu.core_type = #tpu.core_type<tc>, window_params = [{transform_indices = @transform_0, window_bounds = array<i64: 16, 16, 6>}, {pipeline_mode = #tpu.pipeline_mode<synchronous>, transform_indices = @transform_1, window_bounds = array<i64: 6, 32>}, {transform_indices = @transform_2, window_bounds = array<i64: 16, 16, 32>}, {transform_indices = @transform_3, window_bounds = array<i64: 1, 32>}, {transform_indices = @transform_4, window_bounds = array<i64: 1, 32>}]} {
    %c0 = arith.constant 0 : index
    %c0_0 = arith.constant 0 : index
    %c0_1 = arith.constant 0 : index
    %0 = vector.load %arg1[%c0, %c0_0, %c0_1] : memref<16x16x6xbf16, #tpu.memory_space<vmem>>, vector<16x16x6xbf16>
    %1 = arith.extf %0 : vector<16x16x6xbf16> to vector<16x16x6xf32>
    %2 = vector.shape_cast %1 : vector<16x16x6xf32> to vector<256x6xf32>
    %3 = arith.truncf %2 : vector<256x6xf32> to vector<256x6xbf16>
    %c0_2 = arith.constant 0 : index
    %c0_3 = arith.constant 0 : index
    %4 = vector.load %arg2[%c0_2, %c0_3] : memref<6x32xbf16, #tpu.memory_space<vmem>>, vector<6x32xbf16>
    %cst = arith.constant dense<0.000000e+00> : vector<256x32xf32>
    %5 = tpu.matmul %3, %4, %cst {dimension_numbers = #tpu.dot_dimension_numbers<[1], [0], [0], [1], [0, 0, 1, 1], [], []>} : vector<256x6xbf16>, vector<6x32xbf16>, vector<256x32xf32> -> vector<256x32xf32>
    %6 = vector.shape_cast %5 : vector<256x32xf32> to vector<16x16x32xf32>
    %7 = arith.truncf %6 : vector<16x16x32xf32> to vector<16x16x32xbf16>
    %c0_4 = arith.constant 0 : index
    %c0_5 = arith.constant 0 : index
    %c0_6 = arith.constant 0 : index
    %8 = vector.load %arg3[%c0_4, %c0_5, %c0_6] : memref<16x16x32xbf16, #tpu.memory_space<vmem>>, vector<16x16x32xbf16>
    tpu.vector_store %arg3[%c0_4, %c0_5, %c0_6], %7 {strides = array<i32>} : memref<16x16x32xbf16, #tpu.memory_space<vmem>>, vector<16x16x32xbf16>,
    %cst_7 = arith.constant dense<0.000000e+00> : vector<32xf32>
    %9 = vector.multi_reduction <add>, %6, %cst_7 [0, 1] : vector<16x16x32xf32> to vector<32xf32>
    %10 = vector.shape_cast %9 : vector<32xf32> to vector<1x32xf32>
    %c0_8 = arith.constant 0 : index
    %c0_9 = arith.constant 0 : index
    %11 = vector.load %arg4[%c0_8, %c0_9] : memref<1x32xf32, #tpu.memory_space<vmem>>, vector<1x32xf32>
    tpu.vector_store %arg4[%c0_8, %c0_9], %10 {strides = array<i32>} : memref<1x32xf32, #tpu.memory_space<vmem>>, vector<1x32xf32>,
    %12 = arith.mulf %6, %6 : vector<16x16x32xf32>
    %cst_10 = arith.constant dense<0.000000e+00> : vector<32xf32>
    %13 = vector.multi_reduction <add>, %12, %cst_10 [0, 1] : vector<16x16x32xf32> to vector<32xf32>
    %14 = vector.shape_cast %13 : vector<32xf32> to vector<1x32xf32>
    %c0_11 = arith.constant 0 : index
    %c0_12 = arith.constant 0 : index
    %15 = vector.load %arg5[%c0_11, %c0_12] : memref<1x32xf32, #tpu.memory_space<vmem>>, vector<1x32xf32>
    tpu.vector_store %arg5[%c0_11, %c0_12], %14 {strides = array<i32>} : memref<1x32xf32, #tpu.memory_space<vmem>>, vector<1x32xf32>,
    return
  }
  func.func @transform_0(%arg0: i32) -> (i32, i32, i32) {
    %c0_i32 = arith.constant 0 : i32
    %c0_i32_0 = arith.constant 0 : i32
    %c0_i32_1 = arith.constant 0 : i32
    return %arg0, %c0_i32, %c0_i32_0 : i32, i32, i32
  }
  func.func @transform_1(%arg0: i32) -> (i32, i32) {
    %c0_i32 = arith.constant 0 : i32
    %c0_i32_0 = arith.constant 0 : i32
    %c0_i32_1 = arith.constant 0 : i32
    return %c0_i32, %c0_i32_0 : i32, i32
  }
  func.func @transform_2(%arg0: i32) -> (i32, i32, i32) {
    %c0_i32 = arith.constant 0 : i32
    %c0_i32_0 = arith.constant 0 : i32
    %c0_i32_1 = arith.constant 0 : i32
    return %arg0, %c0_i32, %c0_i32_0 : i32, i32, i32
  }
  func.func @transform_3(%arg0: i32) -> (i32, i32) {
    %c0_i32 = arith.constant 0 : i32
    %c0_i32_0 = arith.constant 0 : i32
    return %arg0, %c0_i32 : i32, i32
  }
  func.func @transform_4(%arg0: i32) -> (i32, i32) {
    %c0_i32 = arith.constant 0 : i32
    %c0_i32_0 = arith.constant 0 : i32
    return %arg0, %c0_i32 : i32, i32
  }
}

</mosaic_0001>

<bundles_post_ra>
// kernel: tpu_custom_call.1
= control target key start
LH: loop header
LB: loop body
LE: loop exit
PB: predicated region body
PF: predicated region fallthrough
CT: control target
= control target key end

     0   :  { %10 = vsyncpa [#allocation3], 0  ;;  %vm147_vm0 = vcmask 1042432   ;;  %vm98_vm1 = vcmask 48128   ;;  %s1290_s0 = inlined_call_operand.vmem [shape: bf16[16,16,6], index: 0, kind: input, shape index: {}]   ;;  %s1291_s1 = inlined_call_operand.vmem [shape: bf16[6,32], index: 1, kind: input, shape index: {}]   ;;  %s1292_s2 = inlined_call_operand.hbm [shape: bf16[16,16,32], index: 2, kind: output, shape index: {0}]   ;;  %s1293_s3 = inlined_call_operand.hbm [shape: f32[1,32], index: 3, kind: output, shape index: {1}]   ;;  %s1294_s4 = inlined_call_operand.hbm [shape: f32[1,32], index: 4, kind: output, shape index: {2}]  }
   0x1   :  { %v97_v0 = vld [vmem:[%s1291_s1] sm:$0x7]  ;;  %v847_v3 = vld [vmem:[%s1290_s0 + $0x8] sm:$0xff]   ;;  %v848_v4 = vld [vmem:[%s1290_s0 + $0x10] sm:$0xff]  }
   0x2   :  { %v846_v1 = vld [vmem:[%s1290_s0] sm:$0xff]   ;;  %839 = vmatprep.subr.msk.bf16.mxu0 %vm147_vm0, %v97_v0  ;;  %v149_v2 = vsel %vm147_vm0, %v97_v0, 0  ;;  %840 = vmatprep.subr.msk.bf16.mxu1 %vm147_vm0, %v97_v0  ;;  %v849_v5 = vld [vmem:[%s1290_s0 + $0x18] sm:$0xff]   ;;  %v855_v8 = vld [vmem:[%s1290_s0 + $0x48] sm:$0xff]  }
   0x3   :  { %804 = vmatpush3.bf16.msra.mxu0 %v149_v2  ;;  %805 = vmatprep.mubr.msk.bf16.mxu0 %vm98_vm1, %v846_v1  ;;  %v850_v6 = vld [vmem:[%s1290_s0 + $0x20] sm:$0xff]   ;;  %v856_v9 = vld [vmem:[%s1290_s0 + $0x50] sm:$0xff]   ;;  %v857_v10 = vld [vmem:[%s1290_s0 + $0x58] sm:$0xff]  }
   0x4   :  { %838 = vmatpush3.bf16.msra.mxu1 %v149_v2  ;;  %v854_v7 = vld [vmem:[%s1290_s0 + $0x40] sm:$0xff]  }
   0x5   :  { %821 = vmatprep.mubr.msk.bf16.mxu1 %vm98_vm1, %v854_v7 }
   0x6   :  { %806 = vmatmul.mubr.msk.bf16.vlgmr.msra.gmra.mrb[0].mxu0 %vm98_vm1, %v847_v3 }
   0x7   :  { %809 = vmatprep.mubr.msk.bf16.mxu0 %vm98_vm1, %v848_v4  ;;  %822 = vmatmul.mubr.msk.bf16.vlgmr.msra.gmra.mrb[0].mxu1 %vm98_vm1, %v855_v8 }
   0x8   :  { %825 = vmatprep.mubr.msk.bf16.mxu1 %vm98_vm1, %v856_v9 }
   0xe   :  { %810 = vmatmul.mubr.msk.bf16.gmra.mrb[4].mxu0 %vm98_vm1, %v849_v5 }
   0xf   :  { %813 = vmatprep.mubr.msk.bf16.mxu0 %vm98_vm1, %v850_v6 }
  0x10   :  { %11 = vsyncpa [#allocation5], 0  ;;  %v851_v11 = vld [vmem:[%s1290_s0 + $0x28] sm:$0xff]   ;;  %v858_v12 = vld [vmem:[%s1290_s0 + $0x60] sm:$0xff]   ;;  %826 = vmatmul.mubr.msk.bf16.gmra.mrb[4].mxu1 %vm98_vm1, %v857_v10  ;;  %vm440_vm2 = vcmask 257024   ;;  %vm473_vm3 = vcmask 261120  }
  0x11   :  { %v852_v13 = vld [vmem:[%s1290_s0 + $0x30] sm:$0xff]   ;;  %829 = vmatprep.mubr.msk.bf16.mxu1 %vm98_vm1, %v858_v12  ;;  %v859_v14 = vld [vmem:[%s1290_s0 + $0x68] sm:$0xff]   ;;  %v853_v15 = vld [vmem:[%s1290_s0 + $0x38] sm:$0xff]  }
  0x12   :  { %v860_v16 = vld [vmem:[%s1290_s0 + $0x70] sm:$0xff]   ;;  %v861_v17 = vld [vmem:[%s1290_s0 + $0x78] sm:$0xff]   ;;  %s932_s0 = smov [#allocation2]  }
  0x13   :  { %s652_s22 = sshll.u32 %s932_s0, 4  ;;  %s1176_s22 = int_to_ptr.vmem [resolvable:$true] %s652_s22 }
  0x14   :  { %s862_s1 = scalar_lea.vmem %s1176_s22, 2048  ;;  %p867_p1 = scmp.lt.s32.totalorder %s1176_s22, %s1176_s22 }
  0x15   :  { %p863_p0 = scmp.ne.s32.totalorder %s1176_s22, %s862_s1  ;;  %p868_p2 = scmp.lt.s32.totalorder %s862_s1, %s862_s1 }
  0x16   :  { %814 = vmatmul.mubr.msk.bf16.gmra.mrb[8].mxu0 %vm98_vm1, %v851_v11 }
  0x17   :  { %817 = vmatprep.mubr.msk.bf16.mxu0 %vm98_vm1, %v852_v13  ;;  %p869_p3 = por %p868_p2, %p867_p1 }
  0x18   :  { %830 = vmatmul.mubr.msk.bf16.gmra.mrb[8].mxu1 %vm98_vm1, %v859_v14 }
  0x19   :  { %833 = vmatprep.mubr.msk.bf16.mxu1 %vm98_vm1, %v860_v16  ;;  %p870_p4 = pnand %p869_p3, %p863_p0 }
  0x1e   :  { %818 = vmatmul.mubr.msk.bf16.gmra.mrb[12].mxu0 %vm98_vm1, %v853_v15 }
  0x20   :  { %834 = vmatmul.mubr.msk.bf16.gmra.mrb[12].mxu1 %vm98_vm1, %v861_v17 }
  0xd9   :  { %v807_v18 = vpop.f32.mrb[0].mxu0 }
  0xda   :  { %v756_v19 = vpack.c.bf16 %v807_v18, %v807_v18  ;;  %v185_v20 = vpop.f32.mrb[1].mxu0  ;;  %v547_v24 = vmul.f32 %v807_v18, %v807_v18  ;;  %v477_v33 = vsel %vm473_vm3, %v807_v18, 0.0  ;;  %v1038_v38 = vpop.f32.mrb[0].mxu1 }
  0xdb   :  { %v754_v21 = vpack.c.bf16 %v185_v20, %v185_v20  ;;  %v545_v22 = vmul.f32 %v185_v20, %v185_v20  ;;  %v808_v23 = vpop.f32.mrb[2].mxu0  ;;  %v474_v27 = vsel %vm473_vm3, %v185_v20, 0.0  ;;  %v772_v41 = vpack.c.bf16 %v1038_v38, %v1038_v38  ;;  %v1043_v42 = vpop.f32.mrb[1].mxu1 }
  0xdc   :  { %443 = vst.msk [vmem:[#allocation2 + $0x8] sm:$0xf] %vm440_vm2, %v756_v19  ;;  %v757_v25 = vpack.c.bf16 %v808_v23, %v808_v23  ;;  %v188_v26 = vpop.f32.mrb[3].mxu0  ;;  %v548_v31 = vmul.f32 %v808_v23, %v808_v23  ;;  %v580_v39 = vsel %vm473_vm3, %v547_v24, 0.0  ;;  %v479_v43 = vsel %vm473_vm3, %v808_v23, 0.0  ;;  %v1047_v48 = vpop.f32.mrb[2].mxu1 }
  0xdd   :  { %441 = vst.msk [vmem:[#allocation2] sm:$0xf] %vm440_vm2, %v754_v21  ;;  %v755_v28 = vpack.c.bf16 %v188_v26, %v188_v26  ;;  %v475_v29 = vsel %vm473_vm3, %v188_v26, 0.0  ;;  %v546_v30 = vmul.f32 %v188_v26, %v188_v26  ;;  %v577_v34 = vsel %vm473_vm3, %v545_v22, 0.0  ;;  %459 = vst.msk [vmem:[#allocation2 + $0x48] sm:$0xf] %vm440_vm2, %v772_v41 }
  0xde   :  { %444 = vst.msk [vmem:[#allocation2 + $0xc] sm:$0xf] %vm440_vm2, %v757_v25  ;;  %v476_v32 = vadd.f32 %v475_v29, %v474_v27  ;;  %v582_v44 = vsel %vm473_vm3, %v548_v31, 0.0  ;;  %v1051_v54 = vpop.f32.mrb[3].mxu1  ;;  %v770_v2 = vpack.c.bf16 %v1043_v42, %v1043_v42  ;;  %v773_v6 = vpack.c.bf16 %v1047_v48, %v1047_v48 }
  0xdf   :  { %442 = vst.msk [vmem:[#allocation2 + $0x4] sm:$0xf] %vm440_vm2, %v755_v28  ;;  %v578_v35 = vsel %vm473_vm3, %v546_v30, 0.0  ;;  %v771_v11 = vpack.c.bf16 %v1051_v54, %v1051_v54 }
  0xe0   :  { %v478_v36 = vadd.f32 %v477_v33, %v476_v32  ;;  %v579_v37 = vadd.f32 %v578_v35, %v577_v34  ;;  %457 = vst.msk [vmem:[#allocation2 + $0x40] sm:$0xf] %vm440_vm2, %v770_v2  ;;  %460 = vst.msk [vmem:[#allocation2 + $0x4c] sm:$0xf] %vm440_vm2, %v773_v6 }
  0xe1   :  { %v811_v40 = vpop.f32.mrb[4].mxu0  ;;  %458 = vst.msk [vmem:[#allocation2 + $0x44] sm:$0xf] %vm440_vm2, %v771_v11 }
  0xe2   :  { %v581_v45 = vadd.f32 %v580_v39, %v579_v37  ;;  %v760_v46 = vpack.c.bf16 %v811_v40, %v811_v40  ;;  %v201_v47 = vpop.f32.mrb[5].mxu0  ;;  %v480_v50 = vadd.f32 %v479_v43, %v478_v36  ;;  %v551_v61 = vmul.f32 %v811_v40, %v811_v40 }
  0xe3   :  { %v758_v49 = vpack.c.bf16 %v201_v47, %v201_v47  ;;  %v481_v51 = vsel %vm473_vm3, %v201_v47, 0.0  ;;  %v549_v52 = vmul.f32 %v201_v47, %v201_v47  ;;  %v812_v53 = vpop.f32.mrb[6].mxu0  ;;  %v485_v3 = vsel %vm473_vm3, %v811_v40, 0.0  ;;  %v1065_v7 = vpop.f32.mrb[4].mxu1 }
  0xe4   :  { %447 = vst.msk [vmem:[#allocation2 + $0x18] sm:$0xf] %vm440_vm2, %v760_v46  ;;  %v583_v55 = vadd.f32 %v582_v44, %v581_v45  ;;  %v761_v56 = vpack.c.bf16 %v812_v53, %v812_v53  ;;  %v204_v57 = vpop.f32.mrb[7].mxu0  ;;  %v482_v58 = vadd.f32 %v481_v51, %v480_v50  ;;  %v552_v4 = vmul.f32 %v812_v53, %v812_v53  ;;  %v1070_v12 = vpop.f32.mrb[5].mxu1 }
  0xe5   :  { %445 = vst.msk [vmem:[#allocation2 + $0x10] sm:$0xf] %vm440_vm2, %v758_v49  ;;  %v584_v59 = vsel %vm473_vm3, %v549_v52, 0.0  ;;  %v759_v60 = vpack.c.bf16 %v204_v57, %v204_v57  ;;  %v483_v63 = vsel %vm473_vm3, %v204_v57, 0.0  ;;  %v550_v0 = vmul.f32 %v204_v57, %v204_v57  ;;  %v1075_v17 = vpop.f32.mrb[6].mxu1 }
  0xe6   :  { %v585_v62 = vadd.f32 %v584_v59, %v583_v55  ;;  %448 = vst.msk [vmem:[#allocation2 + $0x1c] sm:$0xf] %vm440_vm2, %v761_v56  ;;  %v484_v1 = vadd.f32 %v483_v63, %v482_v58  ;;  %v588_v13 = vsel %vm473_vm3, %v551_v61, 0.0  ;;  %v487_v14 = vsel %vm473_vm3, %v812_v53, 0.0  ;;  %v1079_v23 = vpop.f32.mrb[7].mxu1 }
  0xe7   :  { %446 = vst.msk [vmem:[#allocation2 + $0x14] sm:$0xf] %vm440_vm2, %v759_v60  ;;  %v586_v5 = vsel %vm473_vm3, %v550_v0, 0.0  ;;  %v590_v24 = vsel %vm473_vm3, %v552_v4, 0.0  ;;  %v776_v41 = vpack.c.bf16 %v1065_v7, %v1065_v7  ;;  %v774_v47 = vpack.c.bf16 %v1070_v12, %v1070_v12 }
  0xe8   :  { %v486_v8 = vadd.f32 %v485_v3, %v484_v1  ;;  %v587_v9 = vadd.f32 %v586_v5, %v585_v62 }
  0xe9   :  { %v815_v10 = vpop.f32.mrb[8].mxu0  ;;  %463 = vst.msk [vmem:[#allocation2 + $0x58] sm:$0xf] %vm440_vm2, %v776_v41  ;;  %461 = vst.msk [vmem:[#allocation2 + $0x50] sm:$0xf] %vm440_vm2, %v774_v47  ;;  %v507_v41 = vsel %vm473_vm3, %v1051_v54, 0.0 }
  0xea   :  { %v764_v15 = vpack.c.bf16 %v815_v10, %v815_v10  ;;  %v217_v16 = vpop.f32.mrb[9].mxu0  ;;  %v589_v18 = vadd.f32 %v588_v13, %v587_v9  ;;  %v488_v20 = vadd.f32 %v487_v14, %v486_v8  ;;  %v555_v31 = vmul.f32 %v815_v10, %v815_v10 }
  0xeb   :  { %v762_v19 = vpack.c.bf16 %v217_v16, %v217_v16  ;;  %v489_v21 = vsel %vm473_vm3, %v217_v16, 0.0  ;;  %v816_v22 = vpop.f32.mrb[10].mxu0  ;;  %v553_v25 = vmul.f32 %v217_v16, %v217_v16  ;;  %v493_v37 = vsel %vm473_vm3, %v815_v10, 0.0  ;;  %v1092_v43 = vpop.f32.mrb[8].mxu1 }
  0xec   :  { %451 = vst.msk [vmem:[#allocation2 + $0x28] sm:$0xf] %vm440_vm2, %v764_v15  ;;  %v765_v26 = vpack.c.bf16 %v816_v22, %v816_v22  ;;  %v220_v27 = vpop.f32.mrb[11].mxu0  ;;  %v490_v28 = vadd.f32 %v489_v21, %v488_v20  ;;  %v591_v29 = vadd.f32 %v590_v24, %v589_v18  ;;  %v556_v39 = vmul.f32 %v816_v22, %v816_v22  ;;  %v1096_v49 = vpop.f32.mrb[9].mxu1 }
  0xed   :  { %449 = vst.msk [vmem:[#allocation2 + $0x20] sm:$0xf] %vm440_vm2, %v762_v19  ;;  %v763_v30 = vpack.c.bf16 %v220_v27, %v220_v27  ;;  %v592_v32 = vsel %vm473_vm3, %v553_v25, 0.0  ;;  %v491_v33 = vsel %vm473_vm3, %v220_v27, 0.0  ;;  %v554_v34 = vmul.f32 %v220_v27, %v220_v27  ;;  %v1101_v55 = vpop.f32.mrb[10].mxu1 }
  0xee   :  { %452 = vst.msk [vmem:[#allocation2 + $0x2c] sm:$0xf] %vm440_vm2, %v765_v26  ;;  %v593_v35 = vadd.f32 %v592_v32, %v591_v29  ;;  %v492_v36 = vadd.f32 %v491_v33, %v490_v28  ;;  %v596_v50 = vsel %vm473_vm3, %v555_v31, 0.0  ;;  %v495_v51 = vsel %vm473_vm3, %v816_v22, 0.0  ;;  %v1105_v61 = vpop.f32.mrb[11].mxu1 }
  0xef   :  { %450 = vst.msk [vmem:[#allocation2 + $0x24] sm:$0xf] %vm440_vm2, %v763_v30  ;;  %v594_v40 = vsel %vm473_vm3, %v554_v34, 0.0  ;;  %v598_v62 = vsel %vm473_vm3, %v556_v39, 0.0  ;;  %v561_v13 = vmul.f32 %v1043_v42, %v1043_v42  ;;  %v777_v18 = vpack.c.bf16 %v1075_v17, %v1075_v17 }
  0xf0   :  { %v494_v44 = vadd.f32 %v493_v37, %v492_v36  ;;  %v595_v45 = vadd.f32 %v594_v40, %v593_v35  ;;  %v775_v22 = vpack.c.bf16 %v1079_v23, %v1079_v23  ;;  %v505_v27 = vsel %vm473_vm3, %v1043_v42, 0.0 }
  0xf1   :  { %v819_v46 = vpop.f32.mrb[12].mxu0  ;;  %464 = vst.msk [vmem:[#allocation2 + $0x5c] sm:$0xf] %vm440_vm2, %v777_v18  ;;  %v780_v28 = vpack.c.bf16 %v1092_v43, %v1092_v43  ;;  %v608_v34 = vsel %vm473_vm3, %v561_v13, 0.0  ;;  %v562_v42 = vmul.f32 %v1051_v54, %v1051_v54  ;;  %v778_v35 = vpack.c.bf16 %v1096_v49, %v1096_v49 }
  0xf2   :  { %v768_v52 = vpack.c.bf16 %v819_v46, %v819_v46  ;;  %v233_v53 = vpop.f32.mrb[13].mxu0  ;;  %v597_v56 = vadd.f32 %v596_v50, %v595_v45  ;;  %v496_v58 = vadd.f32 %v495_v51, %v494_v44  ;;  %v559_v5 = vmul.f32 %v819_v46, %v819_v46  ;;  %462 = vst.msk [vmem:[#allocation2 + $0x54] sm:$0xf] %vm440_vm2, %v775_v22 }
  0xf3   :  { %v766_v57 = vpack.c.bf16 %v233_v53, %v233_v53  ;;  %v497_v59 = vsel %vm473_vm3, %v233_v53, 0.0  ;;  %v820_v60 = vpop.f32.mrb[14].mxu0  ;;  %v557_v63 = vmul.f32 %v233_v53, %v233_v53  ;;  %v501_v14 = vsel %vm473_vm3, %v819_v46, 0.0  ;;  %v1120_v19 = vpop.f32.mrb[12].mxu1  ;;  %467 = vst.msk [vmem:[#allocation2 + $0x68] sm:$0xf] %vm440_vm2, %v780_v28 }
  0xf4   :  { %455 = vst.msk [vmem:[#allocation2 + $0x38] sm:$0xf] %vm440_vm2, %v768_v52  ;;  %v769_v0 = vpack.c.bf16 %v820_v60, %v820_v60  ;;  %v236_v1 = vpop.f32.mrb[15].mxu0  ;;  %v498_v2 = vadd.f32 %v497_v59, %v496_v58  ;;  %v599_v3 = vadd.f32 %v598_v62, %v597_v56  ;;  %v560_v15 = vmul.f32 %v820_v60, %v820_v60  ;;  %v1124_v24 = vpop.f32.mrb[13].mxu1 }
  0xf5   :  { %453 = vst.msk [vmem:[#allocation2 + $0x30] sm:$0xf] %vm440_vm2, %v766_v57  ;;  %v767_v4 = vpack.c.bf16 %v236_v1, %v236_v1  ;;  %v600_v6 = vsel %vm473_vm3, %v557_v63, 0.0  ;;  %v499_v8 = vsel %vm473_vm3, %v236_v1, 0.0  ;;  %v558_v9 = vmul.f32 %v236_v1, %v236_v1  ;;  %v1133_v29 = vpop.f32.mrb[14].mxu1 }
  0xf6   :  { %456 = vst.msk [vmem:[#allocation2 + $0x3c] sm:$0xf] %vm440_vm2, %v769_v0  ;;  %v601_v10 = vadd.f32 %v600_v6, %v599_v3  ;;  %v500_v11 = vadd.f32 %v499_v8, %v498_v2  ;;  %v604_v25 = vsel %vm473_vm3, %v559_v5, 0.0  ;;  %v503_v26 = vsel %vm473_vm3, %v820_v60, 0.0  ;;  %v1136_v32 = vpop.f32.mrb[15].mxu1 }
  0xf7   :  { %454 = vst.msk [vmem:[#allocation2 + $0x34] sm:$0xf] %vm440_vm2, %v767_v4  ;;  %v602_v16 = vsel %vm473_vm3, %v558_v9, 0.0  ;;  %v606_v33 = vsel %vm473_vm3, %v560_v15, 0.0  ;;  %v781_v39 = vpack.c.bf16 %v1101_v55, %v1101_v55  ;;  %v563_v40 = vmul.f32 %v1038_v38, %v1038_v38  ;;  %465 = vst.msk [vmem:[#allocation2 + $0x60] sm:$0xf] %vm440_vm2, %v778_v35 }
  0xf8   :  { %v502_v20 = vadd.f32 %v501_v14, %v500_v11  ;;  %v603_v21 = vadd.f32 %v602_v16, %v601_v10  ;;  %v779_v44 = vpack.c.bf16 %v1105_v61, %v1105_v61  ;;  %v509_v45 = vsel %vm473_vm3, %v1038_v38, 0.0 }
  0xf9   :  { %468 = vst.msk [vmem:[#allocation2 + $0x6c] sm:$0xf] %vm440_vm2, %v781_v39  ;;  %v564_v50 = vmul.f32 %v1047_v48, %v1047_v48  ;;  %v610_v51 = vsel %vm473_vm3, %v562_v42, 0.0  ;;  %v565_v54 = vmul.f32 %v1070_v12, %v1070_v12  ;;  %v784_v52 = vpack.c.bf16 %v1120_v19, %v1120_v19 }
  0xfa   :  { %v605_v30 = vadd.f32 %v604_v25, %v603_v21  ;;  %v504_v31 = vadd.f32 %v503_v26, %v502_v20  ;;  %466 = vst.msk [vmem:[#allocation2 + $0x64] sm:$0xf] %vm440_vm2, %v779_v44  ;;  %v782_v56 = vpack.c.bf16 %v1124_v24, %v1124_v24  ;;  %v612_v57 = vsel %vm473_vm3, %v563_v40, 0.0 }
  0xfb   :  { %v511_v58 = vsel %vm473_vm3, %v1047_v48, 0.0  ;;  %v513_v59 = vsel %vm473_vm3, %v1070_v12, 0.0  ;;  %471 = vst.msk [vmem:[#allocation2 + $0x78] sm:$0xf] %vm440_vm2, %v784_v52  ;;  %v785_v60 = vpack.c.bf16 %v1133_v29, %v1133_v29  ;;  %v614_v0 = vsel %vm473_vm3, %v564_v50, 0.0 }
  0xfc   :  { %v506_v36 = vadd.f32 %v505_v27, %v504_v31  ;;  %v607_v37 = vadd.f32 %v606_v33, %v605_v30  ;;  %469 = vst.msk [vmem:[#allocation2 + $0x70] sm:$0xf] %vm440_vm2, %v782_v56  ;;  %v616_v48 = vsel %vm473_vm3, %v565_v54, 0.0  ;;  %v566_v12 = vmul.f32 %v1079_v23, %v1079_v23 }
  0xfd   :  { %472 = vst.msk [vmem:[#allocation2 + $0x7c] sm:$0xf] %vm440_vm2, %v785_v60  ;;  %v783_v1 = vpack.c.bf16 %v1136_v32, %v1136_v32  ;;  %v567_v4 = vmul.f32 %v1065_v7, %v1065_v7  ;;  %v515_v5 = vsel %vm473_vm3, %v1079_v23, 0.0 }
  0xfe   :  { %v609_v46 = vadd.f32 %v608_v34, %v607_v37  ;;  %v508_v47 = vadd.f32 %v507_v41, %v506_v36 }
  0xff   :  { %470 = vst.msk [vmem:[#allocation2 + $0x74] sm:$0xf] %vm440_vm2, %v783_v1 }
 0x100   :  { %v510_v38 = vadd.f32 %v509_v45, %v508_v47  ;;  %v611_v53 = vadd.f32 %v610_v51, %v609_v46 }
 0x102   :  { %v613_v62 = vadd.f32 %v612_v57, %v611_v53  ;;  %v512_v63 = vadd.f32 %v511_v58, %v510_v38 }
 0x104   :  { %v514_v2 = vadd.f32 %v513_v59, %v512_v63  ;;  %v615_v3 = vadd.f32 %v614_v0, %v613_v62 }
 0x106   :  { %v617_v6 = vadd.f32 %v616_v48, %v615_v3  ;;  %v516_v8 = vadd.f32 %v515_v5, %v514_v2 }
 0x107   :  { %873 = shalt.err (!%p870_p4)
}
 0x108   :  { %s874_s25 = scalar_lea.hbm %s1292_s2, 2048 }
 0x109   :  { %p875_p5 = scmp.ne.s32.totalorder %s1292_s2, %s874_s25  ;;  %p878_p6 = scmp.lt.u32.totalorder %s874_s25, %s1292_s2 }
 0x10b   :  { %p880_p7 = pnand %p878_p6, %p875_p5 }
 0x10d   :  { %883 = shalt.err (!%p880_p7)
}
 0x10e   :  { %s933_s30 = smov 64   ;;  %s934_s5 = smov 4   ;;  %v517_v23 = vsel %vm473_vm3, %v1065_v7, 0.0  ;;  %v568_v9 = vmul.f32 %v1075_v17, %v1075_v17  ;;  %v618_v10 = vsel %vm473_vm3, %v566_v12, 0.0  ;;  %v569_v11 = vmul.f32 %v1096_v49, %v1096_v49 }
 0x10f   :  { %658 = dma.vmem_to_hbm [thread:$0]  %s1176_s22, 2048, %s1292_s2, [#allocation3], %s933_s30, %s933_s30, %s934_s5   ;;  %v518_v13 = vadd.f32 %v517_v23, %v516_v8  ;;  %v619_v14 = vadd.f32 %v618_v10, %v617_v6  ;;  %v620_v15 = vsel %vm473_vm3, %v567_v4, 0.0  ;;  %v519_v16 = vsel %vm473_vm3, %v1075_v17, 0.0 }
 0x110   :  { %v521_v18 = vsel %vm473_vm3, %v1096_v49, 0.0  ;;  %v622_v21 = vsel %vm473_vm3, %v568_v9, 0.0  ;;  %v624_v22 = vsel %vm473_vm3, %v569_v11, 0.0  ;;  %v570_v25 = vmul.f32 %v1105_v61, %v1105_v61  ;;  %s935_s2 = smov [#allocation4]   ;;  %s936_s9 = smov [#allocation6]  }
 0x111   :  { %v621_v20 = vadd.f32 %v620_v15, %v619_v14  ;;  %v520_v7 = vadd.f32 %v519_v16, %v518_v13  ;;  %v571_v28 = vmul.f32 %v1092_v43, %v1092_v43  ;;  %v523_v17 = vsel %vm473_vm3, %v1105_v61, 0.0  ;;  %s665_s8 = sshll.u32 %s935_s2, 4  ;;  %s675_s10 = sshll.u32 %s936_s9, 4  ;;  %s666_s8 = int_to_ptr.vmem [resolvable:$true] %s665_s8  ;;  %s1257_s10 = int_to_ptr.vmem [resolvable:$true] %s675_s10 }
 0x112   :  { %v525_v49 = vsel %vm473_vm3, %v1092_v43, 0.0  ;;  %v572_v33 = vmul.f32 %v1101_v55, %v1101_v55  ;;  %v626_v34 = vsel %vm473_vm3, %v570_v25, 0.0  ;;  %v573_v42 = vmul.f32 %v1124_v24, %v1124_v24  ;;  %s884_s11 = scalar_lea.vmem %s666_s8, 16  ;;  %s888_s12 = scalar_lea.vmem %s666_s8, 32 }
 0x113   :  { %v522_v26 = vadd.f32 %v521_v18, %v520_v7  ;;  %v623_v27 = vadd.f32 %v622_v21, %v621_v20  ;;  %v628_v37 = vsel %vm473_vm3, %v571_v28, 0.0  ;;  %v527_v61 = vsel %vm473_vm3, %v1101_v55, 0.0  ;;  %p885_p8 = scmp.ne.s32.totalorder %s666_s8, %s884_s11  ;;  %p889_p9 = scmp.lt.s32.totalorder %s666_s8, %s666_s8 }
 0x114   :  { %v529_v39 = vsel %vm473_vm3, %v1124_v24, 0.0  ;;  %v630_v41 = vsel %vm473_vm3, %v572_v33, 0.0  ;;  %v632_v44 = vsel %vm473_vm3, %v573_v42, 0.0  ;;  %v574_v45 = vmul.f32 %v1136_v32, %v1136_v32  ;;  %p890_p10 = scmp.lt.s32.totalorder %s888_s12, %s884_s11 }
 0x115   :  { %v625_v30 = vadd.f32 %v624_v22, %v623_v27  ;;  %v524_v31 = vadd.f32 %v523_v17, %v522_v26  ;;  %v575_v50 = vmul.f32 %v1120_v19, %v1120_v19  ;;  %v531_v55 = vsel %vm473_vm3, %v1136_v32, 0.0 }
 0x116   :  { %v533_v24 = vsel %vm473_vm3, %v1120_v19, 0.0  ;;  %v576_v52 = vmul.f32 %v1133_v29, %v1133_v29  ;;  %v634_v38 = vsel %vm473_vm3, %v574_v45, 0.0  ;;  %v535_v58 = vsel %vm473_vm3, %v1133_v29, 0.0  ;;  %p891_p11 = por %p890_p10, %p889_p9 }
 0x117   :  { %v526_v35 = vadd.f32 %v525_v49, %v524_v31  ;;  %v627_v36 = vadd.f32 %v626_v34, %v625_v30  ;;  %v636_v57 = vsel %vm473_vm3, %v575_v50, 0.0  ;;  %vm543_vm4 = vcmask 253952  }
 0x118   :  { %v638_v32 = vsel %vm473_vm3, %v576_v52, 0.0  ;;  %p892_p12 = pnand %p891_p11, %p885_p8 }
 0x119   :  { %v629_v40 = vadd.f32 %v628_v37, %v627_v36  ;;  %v528_v43 = vadd.f32 %v527_v61, %v526_v35 }
 0x11b   :  { %v530_v46 = vadd.f32 %v529_v39, %v528_v43  ;;  %v631_v47 = vadd.f32 %v630_v41, %v629_v40 }
 0x11d   :  { %v633_v51 = vadd.f32 %v632_v44, %v631_v47  ;;  %v532_v54 = vadd.f32 %v531_v55, %v530_v46 }
 0x11f   :  { %v534_v53 = vadd.f32 %v533_v24, %v532_v54  ;;  %v635_v56 = vadd.f32 %v634_v38, %v633_v51 }
 0x121   :  { %v536_v59 = vadd.f32 %v535_v58, %v534_v53  ;;  %v637_v60 = vadd.f32 %v636_v57, %v635_v56 }
 0x123   :  { %v537_v62 = vrot.slane %v536_v59, 4  ;;  %v639_v63 = vadd.f32 %v638_v32, %v637_v60 }
 0x125   :  { %v538_v0 = vadd.f32 %v537_v62, %v536_v59  ;;  %v640_v19 = vrot.slane %v639_v63, 4 }
 0x127   :  { %v539_v48 = vrot.slane %v538_v0, 2  ;;  %v641_v12 = vadd.f32 %v640_v19, %v639_v63 }
 0x129   :  { %v540_v1 = vadd.f32 %v539_v48, %v538_v0  ;;  %v642_v2 = vrot.slane %v641_v12, 2 }
 0x12b   :  { %v541_v3 = vrot.slane %v540_v1, 1  ;;  %v643_v4 = vadd.f32 %v642_v2, %v641_v12 }
 0x12d   :  { %v542_v29 = vadd.f32 %v541_v3, %v540_v1  ;;  %v644_v5 = vrot.slane %v643_v4, 1 }
 0x12f   :  { %544 = vst.msk [vmem:[#allocation4] sm:$0x1] %vm543_vm4, %v542_v29  ;;  %v645_v6 = vadd.f32 %v644_v5, %v643_v4 }
 0x130   :  { %895 = shalt.err (!%p892_p12)
}
 0x131   :  { %s896_s15 = scalar_lea.hbm %s1293_s3, 16 }
 0x132   :  { %p897_p13 = scmp.ne.s32.totalorder %s1293_s3, %s896_s15  ;;  %p900_p0 = scmp.lt.u32.totalorder %s896_s15, %s1293_s3 }
 0x134   :  { %p902_p1 = pnand %p900_p0, %p897_p13 }
 0x136   :  { %905 = shalt.err (!%p902_p1)
}
 0x137   :  { %668 = dma.vmem_to_hbm [thread:$0]  %s666_s8, 16, %s1293_s3, [#allocation5]   ;;  %646 = vst.msk [vmem:[#allocation6] sm:$0x1] %vm543_vm4, %v645_v6 }
 0x138   :  { %s906_s0 = scalar_lea.vmem %s1257_s10, 16  ;;  %s910_s22 = scalar_lea.vmem %s1257_s10, 32 }
 0x139   :  { %p907_p2 = scmp.ne.s32.totalorder %s1257_s10, %s906_s0  ;;  %p911_p3 = scmp.lt.s32.totalorder %s1257_s10, %s1257_s10 }
 0x13a   :  { %p912_p4 = scmp.lt.s32.totalorder %s910_s22, %s906_s0 }
 0x13c   :  { %p913_p5 = por %p912_p4, %p911_p3 }
 0x13e   :  { %p914_p6 = pnand %p913_p5, %p907_p2 }
 0x140   :  { %917 = shalt.err (!%p914_p6)
}
 0x141   :  { %s918_s24 = scalar_lea.hbm %s1294_s4, 16 }
 0x142   :  { %p919_p7 = scmp.ne.s32.totalorder %s1294_s4, %s918_s24  ;;  %p922_p8 = scmp.lt.u32.totalorder %s918_s24, %s1294_s4 }
 0x144   :  { %p924_p9 = pnand %p922_p8, %p919_p7 }
 0x146   :  { %927 = shalt.err (!%p924_p9)
}
 0x147   :  { %678 = dma.vmem_to_hbm [thread:$0]  %s1257_s10, 16, %s1294_s4, [#allocation5]  }
 0x148   :  { %928 = dma.done.wait [#allocation3], 2048  }
 0x149   :  { %929 = vsyncadd [#allocation3], 4294965248 }
 0x14a   :  { %930 = dma.done.wait [#allocation5], 32  }
 0x14b   :  { %931 = vsyncadd [#allocation5], 4294967264 }
 0x14c   :  { %688 = vsyncpa [#allocation3], 1 }
 0x14d   :  { %689 = vsyncpa [#allocation5], 1 }

</bundles_post_ra>
